<compile_context>
chip_gen: v5e
topology: v5e:2x2
jax: 0.10.0
libtpu: 0.0.40
codegen_flags: <defaults>
</compile_context>

<pallas_src>
import functools

import jax
import jax.numpy as jnp
from jax.experimental import pallas as pl
from jax.experimental.pallas import tpu as pltpu

LANE = 128
SUB_ROWS = 256          # rows per inner sub-tile: (256,128) f32 = 32 vregs per input
NUM_ACC = 4             # se_sum, fg_se_sum, fg_count, focal_sum
ACC_ROWS = NUM_ACC * 8  # each quantity gets one (8,128) vreg slab of partial sums


def _round_up(x, m):
    return (x + m - 1) // m * m


def _tpu_config():
    """Per-generation tiling constants: (block_rows, vmem_limit_bytes, tensorcores)."""
    # Safe-everywhere defaults (identical to the previously validated config).
    block_rows, vmem_limit, n_cores = 2048, 32 * 1024 * 1024, 2
    try:
        vmem = int(pltpu.get_tpu_info().vmem_capacity_bytes)
        if vmem >= 100 * 1024 * 1024:    # v5e / v6e: 128 MiB VMEM, single TensorCore
            block_rows, vmem_limit, n_cores = 4096, 64 * 1024 * 1024, 1
        else:                            # v7x-class: 64 MiB VMEM per TC, 2 TensorCores
            block_rows, vmem_limit, n_cores = 2048, 40 * 1024 * 1024, 2
    except Exception:
        pass
    return block_rows, vmem_limit, n_cores


def _edm_loss_kernel(pred_ref, y_ref, edm_ref, out_ref, *,
                     block_rows, steps_per_split, total, need_mask, lane_aligned):
    p = pl.program_id(0)    # parallel split (both TCs on v7x; trivial size-1 axis elsewhere)
    s = pl.program_id(1)    # sequential step within this split

    # init this split's partial-sum block on its first step
    @pl.when(s == 0)
    def _():
        out_ref[...] = jnp.zeros_like(out_ref)

    # un-clamped block origin (element-row index), used only for tail masking
    row0 = (p * steps_per_split + s) * block_rows

    def fold(v):
        # (SUB_ROWS,128) -> (8,128): tile-aligned reshape + leading-axis sum, pure VPU
        # vreg adds — no cross-lane/sublane movement.
        return v.reshape(SUB_ROWS // 8, 8, LANE).sum(axis=0)

    zero = jnp.zeros((8, LANE), jnp.float32)
    acc_se, acc_fg_se, acc_fg_cnt, acc_focal = zero, zero, zero, zero

    # Inner sub-tile loop (static slices) bounds elementwise live ranges to 256 rows,
    # keeping temporaries in vregs instead of MiB-scale VMEM slabs.
    for sub in range(block_rows // SUB_ROWS):
        lo, hi = sub * SUB_ROWS, (sub + 1) * SUB_ROWS
        x = pred_ref[lo:hi, :].astype(jnp.float32)
        y = y_ref[lo:hi, :].astype(jnp.float32)
        e = edm_ref[lo:hi, :].astype(jnp.float32)

        # one shared exp; sigmoid via EUP approx reciprocal (no f32 divide); stable for all x
        ex = jnp.exp(-jnp.abs(x))
        r = pl.reciprocal(1.0 + ex, approx=True)
        sig = jnp.where(x >= 0.0, r, ex * r)          # sigmoid(x)

        # numerically-stable BCE-with-logits (== F.binary_cross_entropy_with_logits, 'none')
        bce = jnp.maximum(x, 0.0) - x * y + jnp.log(1.0 + ex)
        # pt = exp(-bce), computed algebraically (exact for binary labels) -> one less EUP exp
        pt = y * sig + (1.0 - y) * (1.0 - sig)
        omp = 1.0 - pt
        focal = 0.5 * omp * omp * bce                  # alpha=0.5, gamma=2

        se = sig * e
        yv = y

        if need_mask:
            rid = jax.lax.broadcasted_iota(jnp.int32, (SUB_ROWS, LANE), 0) + (row0 + lo)
            if lane_aligned:
                valid = rid < (total // LANE)
            else:
                lid = jax.lax.broadcasted_iota(jnp.int32, (SUB_ROWS, LANE), 1)
                valid = (rid * LANE + lid) < total
            # selects (not mask-multiplies) so NaN/Inf garbage in the padded tail cannot leak
            se = jnp.where(valid, se, 0.0)
            yv = jnp.where(valid, y, 0.0)
            focal = jnp.where(valid, focal, 0.0)

        acc_se = acc_se + fold(se)                     # sum sigmoid*edm over ALL valid elems
        acc_fg_se = acc_fg_se + fold(se * yv)          # sum sigmoid*edm over y==1
        acc_fg_cnt = acc_fg_cnt + fold(yv)             # count(y==1)
        acc_focal = acc_focal + fold(focal)            # sum focal over all elements

    out_ref[0:8, :] += acc_se
    out_ref[8:16, :] += acc_fg_se
    out_ref[16:24, :] += acc_fg_cnt
    out_ref[24:32, :] += acc_focal


def edm_loss_pallas(pred, y, edm):
    """edm_loss for binary targets y ∈ {0,1} (same contract as the PyTorch module's use).

    Non-binary / soft targets are NOT supported (both the focal pt rewrite and the
    derived background statistics rely on y being exactly 0 or 1).
    """
    total = int(pred.size)
    lane_pad = (-total) % LANE

    pf, yf, ef = pred.reshape(-1), y.reshape(-1), edm.reshape(-1)
    if lane_pad:  # only pad when the element count is not a multiple of 128 (rare)
        pf = jnp.pad(pf, (0, lane_pad))
        yf = jnp.pad(yf, (0, lane_pad))
        ef = jnp.pad(ef, (0, lane_pad))
    rows = (total + lane_pad) // LANE
    pf = pf.reshape(rows, LANE)
    yf = yf.reshape(rows, LANE)
    ef = ef.reshape(rows, LANE)

    cfg_block_rows, vmem_limit, n_cores = _tpu_config()
    # don't use a block (and unrolled kernel) bigger than the input needs
    block_rows = min(cfg_block_rows, _round_up(rows, SUB_ROWS))

    num_blocks = pl.cdiv(rows, block_rows)
    num_splits = n_cores if num_blocks >= n_cores else 1
    steps_per_split = pl.cdiv(num_blocks, num_splits)

    # statically compile the mask away when every block is full and no block is duplicated
    need_mask = (lane_pad != 0
                 or rows % block_rows != 0
                 or num_blocks % num_splits != 0)

    def in_idx(p, s):
        # clamp so every DMA starts in-bounds; fully-out-of-range duplicate blocks are
        # rendered harmless by the in-kernel validity mask.
        return (jnp.minimum(p * steps_per_split + s, num_blocks - 1), 0)

    in_spec = pl.BlockSpec((block_rows, LANE), in_idx)
    out_spec = pl.BlockSpec((None, ACC_ROWS, LANE), lambda p, s: (p, 0, 0))

    kernel = functools.partial(
        _edm_loss_kernel,
        block_rows=block_rows,
        steps_per_split=steps_per_split,
        total=total,
        need_mask=need_mask,
        lane_aligned=(lane_pad == 0),
    )

    bytes_per_elem = (jnp.dtype(pred.dtype).itemsize
                      + jnp.dtype(y.dtype).itemsize
                      + jnp.dtype(edm.dtype).itemsize)

    partials = pl.pallas_call(
        kernel,
        out_shape=jax.ShapeDtypeStruct((num_splits, ACC_ROWS, LANE), jnp.float32),
        grid_spec=pltpu.PrefetchScalarGridSpec(
            num_scalar_prefetch=0,
            grid=(num_splits, steps_per_split),
            in_specs=[in_spec, in_spec, in_spec],
            out_specs=out_spec,
        ),
        compiler_params=pltpu.CompilerParams(
            dimension_semantics=("parallel", "arbitrary"),
            vmem_limit_bytes=vmem_limit,
        ),
        cost_estimate=pl.CostEstimate(
            flops=25 * total,
            transcendentals=2 * total,
            bytes_accessed=bytes_per_elem * total,
        ),
    )(pf, yf, ef)

    # tiny final combine in plain JAX (per-split, per-lane partial sums -> 4 scalars)
    sums = partials.reshape(num_splits, NUM_ACC, 8, LANE).sum(axis=(0, 2, 3))
    se_all, fg_se, fg_cnt, focal_sum = sums[0], sums[1], sums[2], sums[3]
    bg_se = se_all - fg_se           # binary labels: y==0 is the complement of y==1
    bg_cnt = total - fg_cnt
    loss_fg = 1.0 - fg_se / fg_cnt
    loss_bg = bg_se / bg_cnt
    focal_mean = focal_sum / total   # mean over ALL elements, matching torch.mean
    return loss_fg + loss_bg + 2.0 * focal_mean


def edm_loss_reference(pred, y, edm):
    """Pure-JAX reference mirroring the PyTorch module exactly."""
    pred = pred.astype(jnp.float32)
    y = y.astype(jnp.float32)
    edm = edm.astype(jnp.float32)
    s = jax.nn.sigmoid(pred)
    fg = (y == 1.0)
    bg = (y == 0.0)
    loss_fg = 1.0 - jnp.sum(jnp.where(fg, s * edm, 0.0)) / jnp.sum(fg)
    loss_bg = jnp.sum(jnp.where(bg, s * edm, 0.0)) / jnp.sum(bg)
    bce = jnp.maximum(pred, 0.0) - pred * y + jnp.log1p(jnp.exp(-jnp.abs(pred)))
    pt = jnp.exp(-bce)
    focal = jnp.mean(0.5 * (1.0 - pt) ** 2 * bce)
    return loss_fg + loss_bg + 2.0 * focal


if __name__ == "__main__":
    key = jax.random.PRNGKey(0)
    k1, k2, k3 = jax.random.split(key, 3)

    B, C, H, W = 2, 4, 16, 16  # NCHW, like the PyTorch module's inputs
    pred = jax.random.normal(k1, (B, C, H, W), dtype=jnp.float32)        # logits
    y = jax.random.bernoulli(k2, 0.3, (B, C, H, W)).astype(jnp.float32)  # binary targets
    edm = jax.random.uniform(k3, (B, C, H, W), dtype=jnp.float32)        # edge-distance map

    out = jax.block_until_ready(edm_loss_pallas(pred, y, edm))
    ref = jax.block_until_ready(edm_loss_reference(pred, y, edm))

    assert jnp.isfinite(out), "non-finite loss"
    # tolerance accounts for the approximate EUP reciprocal used for sigmoid
    assert jnp.allclose(out, ref, rtol=5e-4, atol=5e-4), (out, ref)
    print("KERNEL_OK")
</pallas_src>

<mosaic_0001>
module attributes {stable_mosaic.version = 11 : i64} {
  func.func @_edm_loss_kernel(%arg0: i32, %arg1: i32, %arg2: memref<256x128xf32, #tpu.memory_space<vmem>>, %arg3: memref<256x128xf32, #tpu.memory_space<vmem>>, %arg4: memref<256x128xf32, #tpu.memory_space<vmem>>, %arg5: memref<1x32x128xf32, #tpu.memory_space<vmem>>) attributes {dimension_semantics = [#tpu.dimension_semantics<parallel>, #tpu.dimension_semantics<arbitrary>], iteration_bounds = array<i64: 1, 1>, scalar_prefetch = 0 : i64, scratch_operands = 0 : i64, tpu.core_type = #tpu.core_type<tc>, window_params = [{transform_indices = @transform_0, window_bounds = array<i64: 256, 128>}, {transform_indices = @transform_1, window_bounds = array<i64: 256, 128>}, {transform_indices = @transform_2, window_bounds = array<i64: 256, 128>}, {transform_indices = @transform_3, window_bounds = array<i64: 1, 32, 128>}]} {
    %c0_i32 = arith.constant 0 : i32
    %0 = arith.cmpi eq, %arg1, %c0_i32 : i32
    %1 = arith.extui %0 : i1 to i32
    %c0_i32_0 = arith.constant 0 : i32
    %2 = arith.cmpi ne, %1, %c0_i32_0 : i32
    scf.if %2 {
      %cst_44 = arith.constant 0.000000e+00 : f32
      %92 = vector.broadcast %cst_44 : f32 to vector<32x128xf32>
      %c0_45 = arith.constant 0 : index
      %c0_46 = arith.constant 0 : index
      %c0_47 = arith.constant 0 : index
      %93 = vector.load %arg5[%c0_45, %c0_46, %c0_47] : memref<1x32x128xf32, #tpu.memory_space<vmem>>, vector<1x32x128xf32>
      %94 = vector.shape_cast %93 : vector<1x32x128xf32> to vector<32x128xf32>
      %95 = vector.shape_cast %92 : vector<32x128xf32> to vector<1x32x128xf32>
      tpu.vector_store %arg5[%c0_45, %c0_46, %c0_47], %95 {strides = array<i32>} : memref<1x32x128xf32, #tpu.memory_space<vmem>>, vector<1x32x128xf32>,
    } else {
    }
    %c1_i32 = arith.constant 1 : i32
    %3 = arith.muli %arg0, %c1_i32 : i32
    %4 = arith.addi %3, %arg1 : i32
    %c256_i32 = arith.constant 256 : i32
    %5 = arith.muli %4, %c256_i32 : i32
    %cst = arith.constant 0.000000e+00 : f32
    %6 = vector.broadcast %cst : f32 to vector<8x128xf32>
    %c0 = arith.constant 0 : index
    %c0_1 = arith.constant 0 : index
    %7 = vector.load %arg2[%c0, %c0_1] : memref<256x128xf32, #tpu.memory_space<vmem>>, vector<256x128xf32>
    %c0_2 = arith.constant 0 : index
    %c0_3 = arith.constant 0 : index
    %8 = vector.load %arg3[%c0_2, %c0_3] : memref<256x128xf32, #tpu.memory_space<vmem>>, vector<256x128xf32>
    %c0_4 = arith.constant 0 : index
    %c0_5 = arith.constant 0 : index
    %9 = vector.load %arg4[%c0_4, %c0_5] : memref<256x128xf32, #tpu.memory_space<vmem>>, vector<256x128xf32>
    %10 = math.absf %7 : vector<256x128xf32>
    %cst_6 = arith.constant 0.000000e+00 : f32
    %11 = vector.broadcast %cst_6 : f32 to vector<256x128xf32>
    %12 = arith.subf %11, %10 : vector<256x128xf32>
    %13 = math.exp %12 : vector<256x128xf32>
    %cst_7 = arith.constant 1.000000e+00 : f32
    %14 = vector.broadcast %cst_7 : f32 to vector<256x128xf32>
    %15 = arith.addf %14, %13 : vector<256x128xf32>
    %16 = tpu.reciprocal %15 {approx = true} : vector<256x128xf32> -> vector<256x128xf32>
    %cst_8 = arith.constant 0.000000e+00 : f32
    %17 = vector.broadcast %cst_8 : f32 to vector<256x128xf32>
    %18 = arith.cmpf oge, %7, %17 : vector<256x128xf32>
    %19 = arith.mulf %13, %16 : vector<256x128xf32>
    %20 = arith.select %18, %16, %19 : vector<256x128xi1>, vector<256x128xf32>
    %cst_9 = arith.constant 0.000000e+00 : f32
    %21 = vector.broadcast %cst_9 : f32 to vector<256x128xf32>
    %22 = arith.maximumf %7, %21 : vector<256x128xf32>
    %23 = arith.mulf %7, %8 : vector<256x128xf32>
    %24 = arith.subf %22, %23 : vector<256x128xf32>
    %cst_10 = arith.constant 1.000000e+00 : f32
    %25 = vector.broadcast %cst_10 : f32 to vector<256x128xf32>
    %26 = arith.addf %25, %13 : vector<256x128xf32>
    %27 = math.log %26 : vector<256x128xf32>
    %28 = arith.addf %24, %27 : vector<256x128xf32>
    %29 = arith.mulf %8, %20 : vector<256x128xf32>
    %cst_11 = arith.constant 1.000000e+00 : f32
    %30 = vector.broadcast %cst_11 : f32 to vector<256x128xf32>
    %31 = arith.subf %30, %8 : vector<256x128xf32>
    %cst_12 = arith.constant 1.000000e+00 : f32
    %32 = vector.broadcast %cst_12 : f32 to vector<256x128xf32>
    %33 = arith.subf %32, %20 : vector<256x128xf32>
    %34 = arith.mulf %31, %33 : vector<256x128xf32>
    %35 = arith.addf %29, %34 : vector<256x128xf32>
    %cst_13 = arith.constant 1.000000e+00 : f32
    %36 = vector.broadcast %cst_13 : f32 to vector<256x128xf32>
    %37 = arith.subf %36, %35 : vector<256x128xf32>
    %cst_14 = arith.constant 5.000000e-01 : f32
    %38 = vector.broadcast %cst_14 : f32 to vector<256x128xf32>
    %39 = arith.mulf %38, %37 : vector<256x128xf32>
    %40 = arith.mulf %39, %37 : vector<256x128xf32>
    %41 = arith.mulf %40, %28 : vector<256x128xf32>
    %42 = arith.mulf %20, %9 : vector<256x128xf32>
    %43 = tpu.iota {dimensions = array<i32: 0>} : vector<256x128xi32>
    %c0_i32_15 = arith.constant 0 : i32
    %44 = arith.addi %5, %c0_i32_15 : i32
    %45 = vector.broadcast %44 : i32 to vector<256x128xi32>
    %46 = arith.addi %43, %45 : vector<256x128xi32>
    %c16_i32 = arith.constant 16 : i32
    %47 = vector.broadcast %c16_i32 : i32 to vector<256x128xi32>
    %48 = arith.cmpi slt, %46, %47 : vector<256x128xi32>
    %cst_16 = arith.constant 0.000000e+00 : f32
    %49 = vector.broadcast %cst_16 : f32 to vector<256x128xf32>
    %50 = arith.select %48, %42, %49 : vector<256x128xi1>, vector<256x128xf32>
    %cst_17 = arith.constant 0.000000e+00 : f32
    %51 = vector.broadcast %cst_17 : f32 to vector<256x128xf32>
    %52 = arith.select %48, %8, %51 : vector<256x128xi1>, vector<256x128xf32>
    %cst_18 = arith.constant 0.000000e+00 : f32
    %53 = vector.broadcast %cst_18 : f32 to vector<256x128xf32>
    %54 = arith.select %48, %41, %53 : vector<256x128xi1>, vector<256x128xf32>
    %55 = vector.shape_cast %50 : vector<256x128xf32> to vector<32x8x128xf32>
    %cst_19 = arith.constant dense<0.000000e+00> : vector<8x128xf32>
    %56 = vector.multi_reduction <add>, %55, %cst_19 [0] : vector<32x8x128xf32> to vector<8x128xf32>
    %57 = arith.addf %6, %56 : vector<8x128xf32>
    %58 = arith.mulf %50, %52 : vector<256x128xf32>
    %59 = vector.shape_cast %58 : vector<256x128xf32> to vector<32x8x128xf32>
    %cst_20 = arith.constant dense<0.000000e+00> : vector<8x128xf32>
    %60 = vector.multi_reduction <add>, %59, %cst_20 [0] : vector<32x8x128xf32> to vector<8x128xf32>
    %61 = arith.addf %6, %60 : vector<8x128xf32>
    %62 = vector.shape_cast %52 : vector<256x128xf32> to vector<32x8x128xf32>
    %cst_21 = arith.constant dense<0.000000e+00> : vector<8x128xf32>
    %63 = vector.multi_reduction <add>, %62, %cst_21 [0] : vector<32x8x128xf32> to vector<8x128xf32>
    %64 = arith.addf %6, %63 : vector<8x128xf32>
    %65 = vector.shape_cast %54 : vector<256x128xf32> to vector<32x8x128xf32>
    %cst_22 = arith.constant dense<0.000000e+00> : vector<8x128xf32>
    %66 = vector.multi_reduction <add>, %65, %cst_22 [0] : vector<32x8x128xf32> to vector<8x128xf32>
    %67 = arith.addf %6, %66 : vector<8x128xf32>
    %c0_23 = arith.constant 0 : index
    %c0_24 = arith.constant 0 : index
    %c0_25 = arith.constant 0 : index
    %68 = vector.load %arg5[%c0_23, %c0_24, %c0_25] : memref<1x32x128xf32, #tpu.memory_space<vmem>>, vector<1x8x128xf32>
    %69 = vector.shape_cast %68 : vector<1x8x128xf32> to vector<8x128xf32>
    %70 = arith.addf %69, %57 : vector<8x128xf32>
    %c0_26 = arith.constant 0 : index
    %c0_27 = arith.constant 0 : index
    %c0_28 = arith.constant 0 : index
    %71 = vector.load %arg5[%c0_26, %c0_27, %c0_28] : memref<1x32x128xf32, #tpu.memory_space<vmem>>, vector<1x8x128xf32>
    %72 = vector.shape_cast %71 : vector<1x8x128xf32> to vector<8x128xf32>
    %73 = vector.shape_cast %70 : vector<8x128xf32> to vector<1x8x128xf32>
    tpu.vector_store %arg5[%c0_26, %c0_27, %c0_28], %73 {strides = array<i32>} : memref<1x32x128xf32, #tpu.memory_space<vmem>>, vector<1x8x128xf32>,
    %c0_29 = arith.constant 0 : index
    %c8 = arith.constant 8 : index
    %c0_30 = arith.constant 0 : index
    %74 = vector.load %arg5[%c0_29, %c8, %c0_30] : memref<1x32x128xf32, #tpu.memory_space<vmem>>, vector<1x8x128xf32>
    %75 = vector.shape_cast %74 : vector<1x8x128xf32> to vector<8x128xf32>
    %76 = arith.addf %75, %61 : vector<8x128xf32>
    %c0_31 = arith.constant 0 : index
    %c8_32 = arith.constant 8 : index
    %c0_33 = arith.constant 0 : index
    %77 = vector.load %arg5[%c0_31, %c8_32, %c0_33] : memref<1x32x128xf32, #tpu.memory_space<vmem>>, vector<1x8x128xf32>
    %78 = vector.shape_cast %77 : vector<1x8x128xf32> to vector<8x128xf32>
    %79 = vector.shape_cast %76 : vector<8x128xf32> to vector<1x8x128xf32>
    tpu.vector_store %arg5[%c0_31, %c8_32, %c0_33], %79 {strides = array<i32>} : memref<1x32x128xf32, #tpu.memory_space<vmem>>, vector<1x8x128xf32>,
    %c0_34 = arith.constant 0 : index
    %c16 = arith.constant 16 : index
    %c0_35 = arith.constant 0 : index
    %80 = vector.load %arg5[%c0_34, %c16, %c0_35] : memref<1x32x128xf32, #tpu.memory_space<vmem>>, vector<1x8x128xf32>
    %81 = vector.shape_cast %80 : vector<1x8x128xf32> to vector<8x128xf32>
    %82 = arith.addf %81, %64 : vector<8x128xf32>
    %c0_36 = arith.constant 0 : index
    %c16_37 = arith.constant 16 : index
    %c0_38 = arith.constant 0 : index
    %83 = vector.load %arg5[%c0_36, %c16_37, %c0_38] : memref<1x32x128xf32, #tpu.memory_space<vmem>>, vector<1x8x128xf32>
    %84 = vector.shape_cast %83 : vector<1x8x128xf32> to vector<8x128xf32>
    %85 = vector.shape_cast %82 : vector<8x128xf32> to vector<1x8x128xf32>
    tpu.vector_store %arg5[%c0_36, %c16_37, %c0_38], %85 {strides = array<i32>} : memref<1x32x128xf32, #tpu.memory_space<vmem>>, vector<1x8x128xf32>,
    %c0_39 = arith.constant 0 : index
    %c24 = arith.constant 24 : index
    %c0_40 = arith.constant 0 : index
    %86 = vector.load %arg5[%c0_39, %c24, %c0_40] : memref<1x32x128xf32, #tpu.memory_space<vmem>>, vector<1x8x128xf32>
    %87 = vector.shape_cast %86 : vector<1x8x128xf32> to vector<8x128xf32>
    %88 = arith.addf %87, %67 : vector<8x128xf32>
    %c0_41 = arith.constant 0 : index
    %c24_42 = arith.constant 24 : index
    %c0_43 = arith.constant 0 : index
    %89 = vector.load %arg5[%c0_41, %c24_42, %c0_43] : memref<1x32x128xf32, #tpu.memory_space<vmem>>, vector<1x8x128xf32>
    %90 = vector.shape_cast %89 : vector<1x8x128xf32> to vector<8x128xf32>
    %91 = vector.shape_cast %88 : vector<8x128xf32> to vector<1x8x128xf32>
    tpu.vector_store %arg5[%c0_41, %c24_42, %c0_43], %91 {strides = array<i32>} : memref<1x32x128xf32, #tpu.memory_space<vmem>>, vector<1x8x128xf32>,
    return
  }
  func.func @transform_0(%arg0: i32, %arg1: i32) -> (i32, i32) {
    %c1_i32 = arith.constant 1 : i32
    %0 = arith.muli %arg0, %c1_i32 : i32
    %1 = arith.addi %0, %arg1 : i32
    %c0_i32 = arith.constant 0 : i32
    %2 = arith.minsi %1, %c0_i32 : i32
    %c0_i32_0 = arith.constant 0 : i32
    %c0_i32_1 = arith.constant 0 : i32
    return %2, %c0_i32_0 : i32, i32
  }
  func.func @transform_1(%arg0: i32, %arg1: i32) -> (i32, i32) {
    %c1_i32 = arith.constant 1 : i32
    %0 = arith.muli %arg0, %c1_i32 : i32
    %1 = arith.addi %0, %arg1 : i32
    %c0_i32 = arith.constant 0 : i32
    %2 = arith.minsi %1, %c0_i32 : i32
    %c0_i32_0 = arith.constant 0 : i32
    %c0_i32_1 = arith.constant 0 : i32
    return %2, %c0_i32_0 : i32, i32
  }
  func.func @transform_2(%arg0: i32, %arg1: i32) -> (i32, i32) {
    %c1_i32 = arith.constant 1 : i32
    %0 = arith.muli %arg0, %c1_i32 : i32
    %1 = arith.addi %0, %arg1 : i32
    %c0_i32 = arith.constant 0 : i32
    %2 = arith.minsi %1, %c0_i32 : i32
    %c0_i32_0 = arith.constant 0 : i32
    %c0_i32_1 = arith.constant 0 : i32
    return %2, %c0_i32_0 : i32, i32
  }
  func.func @transform_3(%arg0: i32, %arg1: i32) -> (i32, i32, i32) {
    %c0_i32 = arith.constant 0 : i32
    %c0_i32_0 = arith.constant 0 : i32
    %c0_i32_1 = arith.constant 0 : i32
    return %arg0, %c0_i32, %c0_i32_0 : i32, i32, i32
  }
}

</mosaic_0001>

<bundles_post_ra>
// kernel: tpu_custom_call.1
= control target key start
LH: loop header
LB: loop body
LE: loop exit
PB: predicated region body
PF: predicated region fallthrough
CT: control target
= control target key end

     0   :  { %8 = vsyncpa [#allocation3], 0  ;;  %s1582_s0 = inlined_call_operand.hbm [shape: f32[16,128], index: 0, kind: input, shape index: {}]   ;;  %s1583_s1 = inlined_call_operand.hbm [shape: f32[16,128], index: 1, kind: input, shape index: {}]   ;;  %s1584_s2 = inlined_call_operand.hbm [shape: f32[16,128], index: 2, kind: input, shape index: {}]   ;;  %s1585_s3 = inlined_call_operand.hbm [shape: f32[1,32,128], index: 3, kind: output, shape index: {}]  }
   0x1   :  { %9 = vsyncpa [#allocation6], 0 }
   0x2   :  { %10 = vsyncpa [#allocation4], 0 }
   0x3   :  { %21 = vsyncadd [#allocation3], 3840  ;;  %s26_s14 = sshll.u32 %s1582_s0, 4  ;;  %s1532_s15 = smov [#allocation2]   ;;  %s27_s14 = int_to_ptr.hbm [resolvable:$true] %s26_s14 }
   0x4   :  { %s28_s16 = sshll.u32 %s1532_s15, 4  ;;  %s1533_s17 = smov 128   ;;  %s29_s16 = int_to_ptr.vmem [resolvable:$true] %s28_s16 }
   0x5   :  { %s1534_s18 = smov 8  }
   0x6   :  { %34 = dma.hbm_to_vmem [thread:$0]  %s27_s14, 256, %s29_s16, [#allocation3], %s1533_s17, %s1533_s17, %s1534_s18  }
   0x7   :  { %45 = vsyncadd [#allocation6], 3840  ;;  %s50_s21 = sshll.u32 %s1583_s1, 4  ;;  %s1535_s22 = smov [#allocation5]   ;;  %s51_s21 = int_to_ptr.hbm [resolvable:$true] %s50_s21 }
   0x8   :  { %s52_s23 = sshll.u32 %s1535_s22, 4  ;;  %s53_s23 = int_to_ptr.vmem [resolvable:$true] %s52_s23 }
   0x9   :  { %58 = dma.hbm_to_vmem [thread:$0]  %s51_s21, 256, %s53_s23, [#allocation6], %s1533_s17, %s1533_s17, %s1534_s18  }
   0xa   :  { %69 = vsyncadd [#allocation6], 3840  ;;  %s74_s25 = sshll.u32 %s1584_s2, 4  ;;  %s1536_s26 = smov [#allocation7]   ;;  %s75_s25 = int_to_ptr.hbm [resolvable:$true] %s74_s25 }
   0xb   :  { %s76_s27 = sshll.u32 %s1536_s26, 4  ;;  %s77_s27 = int_to_ptr.vmem [resolvable:$true] %s76_s27 }
   0xc   :  { %82 = dma.hbm_to_vmem [thread:$0]  %s75_s25, 256, %s77_s27, [#allocation6], %s1533_s17, %s1533_s17, %s1534_s18  }
   0xd   :  { %1526 = dma.done.wait [#allocation3], 4096  }
   0xe   :  { %1527 = vsyncadd [#allocation3], 4294963200 }
   0xf   :  { %1528 = dma.done.wait [#allocation6], 8192  }
  0x10   :  { %1529 = vsyncadd [#allocation6], 4294959104  ;;  %v123_v0 = vld [vmem:[#allocation2] sm:$0xff]  ;;  %v124_v1 = vld [vmem:[#allocation2 + $0x8] sm:$0xff]  ;;  %s1537_s1 = smov [#allocation8]   ;;  %s1391_s30 = sshll.u32 %s1585_s3, 4  ;;  %s1392_s30 = int_to_ptr.hbm [resolvable:$true] %s1391_s30 }
  0x11   :  { %v219_v2 = vand.u32 2147483647, %v123_v0  ;;  %v155_v3 = vld [vmem:[#allocation5] sm:$0xff]  ;;  %v156_v4 = vld [vmem:[#allocation5 + $0x8] sm:$0xff]  ;;  %v220_v5 = vand.u32 2147483647, %v124_v1 }
  0x12   :  { %v1309_v7 = vadd.f32 %v156_v4, %v155_v3  ;;  %vm411_vm0 = vcmp.ge.f32.partialorder %v123_v0, 0.0  ;;  %v187_v17 = vld [vmem:[#allocation7] sm:$0xff]  ;;  %vm412_vm1 = vcmp.ge.f32.partialorder %v124_v1, 0.0  ;;  %v188_v19 = vld [vmem:[#allocation7 + $0x8] sm:$0xff]  ;;  %v507_v21 = vmax.f32 %v123_v0, 0.0  ;;  %s1389_s2 = sshll.u32 %s1537_s1, 4  ;;  %s1390_s2 = int_to_ptr.vmem [resolvable:$true] %s1389_s2 }
  0x13   :  { %v251_v6 = vsub.f32 0.0, %v219_v2  ;;  %v252_v8 = vsub.f32 0.0, %v220_v5  ;;  %v539_v22 = vmul.f32 %v155_v3, %v123_v0  ;;  %v731_v23 = vsub.f32 1.0, %v155_v3 }
  0x14   :  { %1381 = vst [vmem:[#allocation8 + $0x10] sm:$0xff] %v1309_v7  ;;  %v508_v25 = vmax.f32 %v124_v1, 0.0  ;;  %v540_v26 = vmul.f32 %v156_v4, %v124_v1  ;;  %v732_v27 = vsub.f32 1.0, %v156_v4 }
  0x15   :  { %v283_v9 = vmul.f32 1.442695, %v251_v6  ;;  %v285_v10 = vmul.f32 1.442695, %v252_v8  ;;  %v571_v42 = vsub.f32 %v507_v21, %v539_v22 }
  0x16   :  { %v572_v43 = vsub.f32 %v508_v25, %v540_v26 }
  0x17   :  { %1418 = vpow2.f32 %v283_v9 }
  0x18   :  { %1420 = vpow2.f32 %v285_v10 }
  0x1d   :  { %v1419_v11 = vpop.eup %1418 }
  0x1e   :  { %v1421_v12 = vpop.eup %1420  ;;  %v347_v13 = vadd.f32 1.0, %v1419_v11 }
  0x1f   :  { %v348_v14 = vadd.f32 1.0, %v1421_v12 }
  0x20   :  { %1422 = vrcp.f32 %v347_v13 }
  0x21   :  { %1424 = vrcp.f32 %v348_v14 }
  0x22   :  { %1426 = vlog2.f32 %v347_v13 }
  0x23   :  { %1428 = vlog2.f32 %v348_v14 }
  0x26   :  { %v1423_v15 = vpop.eup %1422 }
  0x27   :  { %v1425_v16 = vpop.eup %1424  ;;  %v443_v18 = vmul.f32 %v1423_v15, %v1419_v11 }
  0x28   :  { %v444_v20 = vmul.f32 %v1425_v16, %v1421_v12  ;;  %v1427_v32 = vpop.eup %1426 }
  0x29   :  { %v475_v24 = vsel %vm411_vm0, %v1423_v15, %v443_v18  ;;  %v1429_v36 = vpop.eup %1428  ;;  %v604_v44 = vmul.f32 0.6931472, %v1427_v32 }
  0x2a   :  { %v476_v28 = vsel %vm412_vm1, %v1425_v16, %v444_v20  ;;  %v699_v29 = vmul.f32 %v475_v24, %v155_v3  ;;  %v763_v30 = vsub.f32 1.0, %v475_v24  ;;  %v987_v31 = vmul.f32 %v475_v24, %v187_v17 }
  0x2b   :  { %v700_v33 = vmul.f32 %v476_v28, %v156_v4  ;;  %v764_v34 = vsub.f32 1.0, %v476_v28  ;;  %v988_v35 = vmul.f32 %v476_v28, %v188_v19  ;;  %v606_v47 = vmul.f32 0.6931472, %v1429_v36 }
  0x2c   :  { %v1245_v37 = vmul.f32 %v987_v31, %v155_v3  ;;  %v795_v38 = vmul.f32 %v763_v30, %v731_v23  ;;  %v667_v51 = vadd.f32 %v604_v44, %v571_v42 }
  0x2d   :  { %v1213_v39 = vadd.f32 %v988_v35, %v987_v31  ;;  %v1246_v40 = vmul.f32 %v988_v35, %v156_v4  ;;  %v796_v41 = vmul.f32 %v764_v34, %v732_v27  ;;  %v668_v53 = vadd.f32 %v606_v47, %v572_v43 }
  0x2e   :  { %v827_v45 = vadd.f32 %v795_v38, %v699_v29 }
  0x2f   :  { %v1277_v46 = vadd.f32 %v1246_v40, %v1245_v37  ;;  %v828_v48 = vadd.f32 %v796_v41, %v700_v33  ;;  %1375 = vst [vmem:[#allocation8] sm:$0xff] %v1213_v39 }
  0x30   :  { %v859_v49 = vsub.f32 1.0, %v827_v45 }
  0x31   :  { %v860_v50 = vsub.f32 1.0, %v828_v48  ;;  %1378 = vst [vmem:[#allocation8 + $0x8] sm:$0xff] %v1277_v46 }
  0x32   :  { %v891_v52 = vmul.f32 0.5, %v859_v49 }
  0x33   :  { %v892_v54 = vmul.f32 0.5, %v860_v50 }
  0x34   :  { %v923_v55 = vmul.f32 %v891_v52, %v859_v49 }
  0x35   :  { %v924_v56 = vmul.f32 %v892_v54, %v860_v50 }
  0x36   :  { %v955_v57 = vmul.f32 %v923_v55, %v667_v51 }
  0x37   :  { %v956_v58 = vmul.f32 %v924_v56, %v668_v53 }
  0x39   :  { %v1341_v59 = vadd.f32 %v956_v58, %v955_v57 }
  0x3b   :  { %1384 = vst [vmem:[#allocation8 + $0x18] sm:$0xff] %v1341_v59 }
  0x3c   :  { %1397 = dma.vmem_to_hbm [thread:$0]  %s1390_s2, 512, %s1392_s30, [#allocation4], %s1533_s17, %s1533_s17, %s1534_s18  }
  0x3d   :  { %1530 = dma.done.wait [#allocation4], 512  }
  0x3e   :  { %1531 = vsyncadd [#allocation4], 4294966784 }
  0x3f   :  { %1402 = vsyncpa [#allocation3], 1 }
  0x40   :  { %1403 = vsyncpa [#allocation6], 1 }
  0x41   :  { %1404 = vsyncpa [#allocation4], 1 }

</bundles_post_ra>
